<compile_context>
chip_gen: v6e
topology: v6e:2x2x1
jax: 0.10.0
libtpu: 0.0.40
codegen_flags: <defaults>
</compile_context>

<pallas_src>
import jax
import jax.numpy as jnp
from jax.experimental import pallas as pl
from jax.experimental.pallas import tpu as pltpu


def _round_up(v, m):
    return ((v + m - 1) // m) * m


def _vmem_capacity_bytes():
    try:
        info = pltpu.get_tpu_info()
        cap = getattr(info, "vmem_capacity_bytes", None)
        if cap:
            return int(cap)
    except Exception:
        pass
    return 64 << 20  # conservative default (v7x per-TC VMEM)


def _make_kernel(n_valid, n_pad, neg_slope=0.2, eps=1e-5):
    """n_valid = true outsize; columns >= n_valid are zero-padding added by the
    wrapper for lane alignment and must be excluded from the row reductions."""
    need_mask = n_valid != n_pad
    inv_n = 1.0 / float(n_valid)

    def kernel(x_ref, w_ref, b_ref, g_ref, beta_ref, o_ref):
        k = pl.program_id(1)

        @pl.when(k == 0)
        def _():
            o_ref[...] = jnp.zeros_like(o_ref)

        # Linear: bf16 MXU matmul, f32 accumulation directly into the
        # output block (its index map is constant along k -> resident).
        o_ref[...] += jnp.dot(x_ref[...], w_ref[...],
                              preferred_element_type=jnp.float32)

        @pl.when(k == pl.num_programs(1) - 1)
        def _():
            y = o_ref[...] + b_ref[...]

            if need_mask:
                col = jax.lax.broadcasted_iota(jnp.int32, y.shape, 1)
                valid = col < n_valid
                y_s = jnp.where(valid, y, -jnp.inf)
            else:
                valid = None
                y_s = y

            # nn.Softmax() on a 2D tensor -> softmax over dim=1 (features).
            # Padded columns contribute exp(-inf) == 0 to the row sum.
            m = jnp.max(y_s, axis=-1, keepdims=True)
            e = jnp.exp(y_s - m)
            sm = e * pl.reciprocal(jnp.sum(e, axis=-1, keepdims=True),
                                   approx=True)

            # output = output + output * softmax(output)
            z = y + y * sm
            if valid is not None:
                z = jnp.where(valid, z, 0.0)

            # LayerNorm(outsize), eps=1e-5. Two-pass mean/variance.
            mu = jnp.sum(z, axis=-1, keepdims=True) * inv_n
            d = z - mu
            if valid is not None:
                d = jnp.where(valid, d, 0.0)
            var = jnp.sum(d * d, axis=-1, keepdims=True) * inv_n
            zn = d * jax.lax.rsqrt(var + eps)
            zn = zn * g_ref[...] + beta_ref[...]

            # LeakyReLU(0.2)
            o_ref[...] = jnp.where(zn >= 0, zn, neg_slope * zn).astype(o_ref.dtype)

    return kernel


def basic_linear_rot(x, w_t, b, gamma, beta, *, tb_max=512):
    """x: (B, insize); w_t: (insize, outsize) (= torch weight.T);
    b/gamma/beta: (1, outsize). Returns (B, outsize) float32."""
    B, insize = x.shape
    assert w_t.shape[0] == insize
    outsize = w_t.shape[1]
    n_pad = _round_up(outsize, 128)

    # Dominant streams in bf16 (the MXU input dtype) -> half the HBM traffic
    # and half the double-buffered VMEM footprint.
    x = x.astype(jnp.bfloat16)
    w_t = w_t.astype(jnp.bfloat16)
    b = b.astype(jnp.float32)
    gamma = gamma.astype(jnp.float32)
    beta = beta.astype(jnp.float32)

    # --- pad the feature axis to a lane-dense multiple of 128 --------------
    if n_pad != outsize:
        pn = n_pad - outsize
        w_t = jnp.pad(w_t, ((0, 0), (0, pn)))
        b = jnp.pad(b, ((0, 0), (0, pn)))
        gamma = jnp.pad(gamma, ((0, 0), (0, pn)))
        beta = jnp.pad(beta, ((0, 0), (0, pn)))

    # --- tile planning against the per-chip VMEM budget ---------------------
    cap = _vmem_capacity_bytes()
    budget = int(cap * 0.85)

    def vmem_need(tb_, tk_):
        return (2 * tb_ * tk_ * 2          # x tiles (bf16, double buffered)
                + 2 * tk_ * n_pad * 2      # weight slab (bf16, double buffered)
                + 2 * tb_ * n_pad * 4      # output/accumulator tiles (f32)
                + 3 * 8 * n_pad * 4)       # bias / gamma / beta

    tb = min(tb_max, _round_up(B, 16))       # multiple of 16: bf16 sublanes
    if B >= 32 and pl.cdiv(B, tb) <= 1:
        # give both TensorCores (v7x megacore) at least one batch tile
        tb = max(16, _round_up((B + 1) // 2, 16))

    # Prefer a fully VMEM-resident weight (tk == insize): DMA'd once, reused
    # by every batch tile instead of being re-streamed from HBM.
    tk = insize
    while tb > 16 and vmem_need(tb, tk) > budget:
        tb = max(16, _round_up(tb // 2, 16))

    if vmem_need(tb, tk) > budget:
        # Weight too large to keep resident: stream it in 128-aligned K tiles
        # (largest power-of-two multiple of 128 that still fits the budget).
        k_full = _round_up(insize, 128)
        tk = 128
        while tk * 2 <= k_full and vmem_need(tb, tk * 2) <= budget:
            tk *= 2

    k_pad = _round_up(insize, tk)
    b_pad = _round_up(B, tb)

    if b_pad != B or k_pad != insize:
        x = jnp.pad(x, ((0, b_pad - B), (0, k_pad - insize)))
    if k_pad != insize:
        w_t = jnp.pad(w_t, ((0, k_pad - insize), (0, 0)))

    grid = (b_pad // tb, k_pad // tk)
    kernel = _make_kernel(outsize, n_pad)

    vmem_limit = int(min(cap, max(vmem_need(tb, tk) + (4 << 20), 16 << 20)))

    out = pl.pallas_call(
        kernel,
        out_shape=jax.ShapeDtypeStruct((b_pad, n_pad), jnp.float32),
        grid_spec=pltpu.PrefetchScalarGridSpec(
            num_scalar_prefetch=0,
            grid=grid,
            in_specs=[
                pl.BlockSpec((tb, tk), lambda i, k: (i, k)),      # x tile (bf16)
                pl.BlockSpec((tk, n_pad), lambda i, k: (k, 0)),   # weight (bf16)
                pl.BlockSpec((1, n_pad), lambda i, k: (0, 0)),    # bias
                pl.BlockSpec((1, n_pad), lambda i, k: (0, 0)),    # LN gamma
                pl.BlockSpec((1, n_pad), lambda i, k: (0, 0)),    # LN beta
            ],
            out_specs=pl.BlockSpec((tb, n_pad), lambda i, k: (i, 0)),
        ),
        compiler_params=pltpu.CompilerParams(
            dimension_semantics=("parallel", "arbitrary"),
            vmem_limit_bytes=vmem_limit,
        ),
    )(x, w_t, b, gamma, beta)

    return out[:B, :outsize]


if __name__ == "__main__":
    key = jax.random.PRNGKey(0)
    B, insize, outsize = 8, 32, 128

    kx, kw, kb = jax.random.split(key, 3)
    x = jax.random.normal(kx, (B, insize), dtype=jnp.float32)

    # PyTorch Linear-style uniform init (bound 1/sqrt(insize))
    bound = 1.0 / (insize ** 0.5)
    w = jax.random.uniform(kw, (outsize, insize), minval=-bound, maxval=bound,
                           dtype=jnp.float32)            # torch layout (out, in)
    b = jax.random.uniform(kb, (1, outsize), minval=-bound, maxval=bound,
                           dtype=jnp.float32)
    gamma = jnp.ones((1, outsize), dtype=jnp.float32)     # LayerNorm weight
    beta = jnp.zeros((1, outsize), dtype=jnp.float32)     # LayerNorm bias

    w_t = w.T  # (insize, outsize) for the kernel

    out = basic_linear_rot(x, w_t, b, gamma, beta)
    jax.block_until_ready(out)

    # pure-JAX reference (matmul in bf16 to mirror the kernel's MXU path)
    y = jnp.dot(x.astype(jnp.bfloat16), w_t.astype(jnp.bfloat16),
                preferred_element_type=jnp.float32) + b
    sm = jax.nn.softmax(y, axis=-1)
    z = y + y * sm
    mu = z.mean(-1, keepdims=True)
    var = ((z - mu) ** 2).mean(-1, keepdims=True)
    zn = (z - mu) / jnp.sqrt(var + 1e-5) * gamma + beta
    ref = jnp.where(zn >= 0, zn, 0.2 * zn)

    assert out.shape == (B, outsize)
    # slightly looser than 1e-4: approx (EUP) reciprocal in the softmax denom
    assert jnp.allclose(out, ref, atol=5e-3, rtol=5e-3), \
        float(jnp.max(jnp.abs(out - ref)))

    print("KERNEL_OK")
</pallas_src>

<mosaic_0001>
module attributes {stable_mosaic.version = 11 : i64} {
  func.func @kernel(%arg0: i32, %arg1: i32, %arg2: memref<16x32xbf16, #tpu.memory_space<vmem>>, %arg3: memref<32x128xbf16, #tpu.memory_space<vmem>>, %arg4: memref<1x128xf32, #tpu.memory_space<vmem>>, %arg5: memref<1x128xf32, #tpu.memory_space<vmem>>, %arg6: memref<1x128xf32, #tpu.memory_space<vmem>>, %arg7: memref<16x128xf32, #tpu.memory_space<vmem>>) attributes {dimension_semantics = [#tpu.dimension_semantics<parallel>, #tpu.dimension_semantics<arbitrary>], iteration_bounds = array<i64: 1, 1>, scalar_prefetch = 0 : i64, scratch_operands = 0 : i64, tpu.core_type = #tpu.core_type<tc>, window_params = [{transform_indices = @transform_0, window_bounds = array<i64: 16, 32>}, {transform_indices = @transform_1, window_bounds = array<i64: 32, 128>}, {pipeline_mode = #tpu.pipeline_mode<synchronous>, transform_indices = @transform_2, window_bounds = array<i64: 1, 128>}, {pipeline_mode = #tpu.pipeline_mode<synchronous>, transform_indices = @transform_3, window_bounds = array<i64: 1, 128>}, {pipeline_mode = #tpu.pipeline_mode<synchronous>, transform_indices = @transform_4, window_bounds = array<i64: 1, 128>}, {transform_indices = @transform_5, window_bounds = array<i64: 16, 128>}]} {
    %c0_i32 = arith.constant 0 : i32
    %0 = arith.cmpi eq, %arg1, %c0_i32 : i32
    %1 = arith.extui %0 : i1 to i32
    %c0_i32_0 = arith.constant 0 : i32
    %2 = arith.cmpi ne, %1, %c0_i32_0 : i32
    scf.if %2 {
      %cst_10 = arith.constant 0.000000e+00 : f32
      %12 = vector.broadcast %cst_10 : f32 to vector<16x128xf32>
      %c0_11 = arith.constant 0 : index
      %c0_12 = arith.constant 0 : index
      %13 = vector.load %arg7[%c0_11, %c0_12] : memref<16x128xf32, #tpu.memory_space<vmem>>, vector<16x128xf32>
      tpu.vector_store %arg7[%c0_11, %c0_12], %12 {strides = array<i32>} : memref<16x128xf32, #tpu.memory_space<vmem>>, vector<16x128xf32>,
    } else {
    }
    %c0 = arith.constant 0 : index
    %c0_1 = arith.constant 0 : index
    %3 = vector.load %arg7[%c0, %c0_1] : memref<16x128xf32, #tpu.memory_space<vmem>>, vector<16x128xf32>
    %c0_2 = arith.constant 0 : index
    %c0_3 = arith.constant 0 : index
    %4 = vector.load %arg2[%c0_2, %c0_3] : memref<16x32xbf16, #tpu.memory_space<vmem>>, vector<16x32xbf16>
    %c0_4 = arith.constant 0 : index
    %c0_5 = arith.constant 0 : index
    %5 = vector.load %arg3[%c0_4, %c0_5] : memref<32x128xbf16, #tpu.memory_space<vmem>>, vector<32x128xbf16>
    %cst = arith.constant dense<0.000000e+00> : vector<16x128xf32>
    %6 = tpu.matmul %4, %5, %cst {dimension_numbers = #tpu.dot_dimension_numbers<[1], [0], [0], [1], [0, 0, 1, 1], [], []>} : vector<16x32xbf16>, vector<32x128xbf16>, vector<16x128xf32> -> vector<16x128xf32>
    %7 = arith.addf %3, %6 : vector<16x128xf32>
    %c0_6 = arith.constant 0 : index
    %c0_7 = arith.constant 0 : index
    %8 = vector.load %arg7[%c0_6, %c0_7] : memref<16x128xf32, #tpu.memory_space<vmem>>, vector<16x128xf32>
    tpu.vector_store %arg7[%c0_6, %c0_7], %7 {strides = array<i32>} : memref<16x128xf32, #tpu.memory_space<vmem>>, vector<16x128xf32>,
    %c0_i32_8 = arith.constant 0 : i32
    %9 = arith.cmpi eq, %arg1, %c0_i32_8 : i32
    %10 = arith.extui %9 : i1 to i32
    %c0_i32_9 = arith.constant 0 : i32
    %11 = arith.cmpi ne, %10, %c0_i32_9 : i32
    scf.if %11 {
      %c0_10 = arith.constant 0 : index
      %c0_11 = arith.constant 0 : index
      %12 = vector.load %arg7[%c0_10, %c0_11] : memref<16x128xf32, #tpu.memory_space<vmem>>, vector<16x128xf32>
      %c0_12 = arith.constant 0 : index
      %c0_13 = arith.constant 0 : index
      %13 = vector.load %arg4[%c0_12, %c0_13] : memref<1x128xf32, #tpu.memory_space<vmem>>, vector<1x128xf32>
      %14 = vector.broadcast %13 : vector<1x128xf32> to vector<16x128xf32>
      %15 = arith.addf %12, %14 : vector<16x128xf32>
      %cst_14 = arith.constant dense<0xFF800000> : vector<16xf32>
      %16 = vector.multi_reduction <maximumf>, %15, %cst_14 [1] : vector<16x128xf32> to vector<16xf32>
      %17 = vector.shape_cast %16 : vector<16xf32> to vector<16x1xf32>
      %18 = vector.broadcast %17 : vector<16x1xf32> to vector<16x128xf32>
      %19 = arith.subf %15, %18 : vector<16x128xf32>
      %20 = math.exp %19 : vector<16x128xf32>
      %cst_15 = arith.constant dense<0.000000e+00> : vector<16xf32>
      %21 = vector.multi_reduction <add>, %20, %cst_15 [1] : vector<16x128xf32> to vector<16xf32>
      %22 = vector.shape_cast %21 : vector<16xf32> to vector<16x1xf32>
      %23 = tpu.reciprocal %22 {approx = true} : vector<16x1xf32> -> vector<16x1xf32>
      %24 = vector.broadcast %23 : vector<16x1xf32> to vector<16x128xf32>
      %25 = arith.mulf %20, %24 : vector<16x128xf32>
      %26 = arith.mulf %15, %25 : vector<16x128xf32>
      %27 = arith.addf %15, %26 : vector<16x128xf32>
      %cst_16 = arith.constant dense<0.000000e+00> : vector<16xf32>
      %28 = vector.multi_reduction <add>, %27, %cst_16 [1] : vector<16x128xf32> to vector<16xf32>
      %29 = vector.shape_cast %28 : vector<16xf32> to vector<16x1xf32>
      %cst_17 = arith.constant 7.812500e-03 : f32
      %30 = vector.broadcast %cst_17 : f32 to vector<16x1xf32>
      %31 = arith.mulf %29, %30 : vector<16x1xf32>
      %32 = vector.broadcast %31 : vector<16x1xf32> to vector<16x128xf32>
      %33 = arith.subf %27, %32 : vector<16x128xf32>
      %34 = arith.mulf %33, %33 : vector<16x128xf32>
      %cst_18 = arith.constant dense<0.000000e+00> : vector<16xf32>
      %35 = vector.multi_reduction <add>, %34, %cst_18 [1] : vector<16x128xf32> to vector<16xf32>
      %36 = vector.shape_cast %35 : vector<16xf32> to vector<16x1xf32>
      %cst_19 = arith.constant 7.812500e-03 : f32
      %37 = vector.broadcast %cst_19 : f32 to vector<16x1xf32>
      %38 = arith.mulf %36, %37 : vector<16x1xf32>
      %cst_20 = arith.constant 9.99999974E-6 : f32
      %39 = vector.broadcast %cst_20 : f32 to vector<16x1xf32>
      %40 = arith.addf %38, %39 : vector<16x1xf32>
      %41 = math.rsqrt %40 : vector<16x1xf32>
      %42 = vector.broadcast %41 : vector<16x1xf32> to vector<16x128xf32>
      %43 = arith.mulf %33, %42 : vector<16x128xf32>
      %c0_21 = arith.constant 0 : index
      %c0_22 = arith.constant 0 : index
      %44 = vector.load %arg5[%c0_21, %c0_22] : memref<1x128xf32, #tpu.memory_space<vmem>>, vector<1x128xf32>
      %45 = vector.broadcast %44 : vector<1x128xf32> to vector<16x128xf32>
      %46 = arith.mulf %43, %45 : vector<16x128xf32>
      %c0_23 = arith.constant 0 : index
      %c0_24 = arith.constant 0 : index
      %47 = vector.load %arg6[%c0_23, %c0_24] : memref<1x128xf32, #tpu.memory_space<vmem>>, vector<1x128xf32>
      %48 = vector.broadcast %47 : vector<1x128xf32> to vector<16x128xf32>
      %49 = arith.addf %46, %48 : vector<16x128xf32>
      %cst_25 = arith.constant 0.000000e+00 : f32
      %50 = vector.broadcast %cst_25 : f32 to vector<16x128xf32>
      %51 = arith.cmpf oge, %49, %50 : vector<16x128xf32>
      %cst_26 = arith.constant 2.000000e-01 : f32
      %52 = vector.broadcast %cst_26 : f32 to vector<16x128xf32>
      %53 = arith.mulf %52, %49 : vector<16x128xf32>
      %54 = arith.select %51, %49, %53 : vector<16x128xi1>, vector<16x128xf32>
      %c0_27 = arith.constant 0 : index
      %c0_28 = arith.constant 0 : index
      %55 = vector.load %arg7[%c0_27, %c0_28] : memref<16x128xf32, #tpu.memory_space<vmem>>, vector<16x128xf32>
      tpu.vector_store %arg7[%c0_27, %c0_28], %54 {strides = array<i32>} : memref<16x128xf32, #tpu.memory_space<vmem>>, vector<16x128xf32>,
    } else {
    }
    return
  }
  func.func @transform_0(%arg0: i32, %arg1: i32) -> (i32, i32) {
    %c0_i32 = arith.constant 0 : i32
    return %arg0, %arg1 : i32, i32
  }
  func.func @transform_1(%arg0: i32, %arg1: i32) -> (i32, i32) {
    %c0_i32 = arith.constant 0 : i32
    %c0_i32_0 = arith.constant 0 : i32
    return %arg1, %c0_i32 : i32, i32
  }
  func.func @transform_2(%arg0: i32, %arg1: i32) -> (i32, i32) {
    %c0_i32 = arith.constant 0 : i32
    %c0_i32_0 = arith.constant 0 : i32
    %c0_i32_1 = arith.constant 0 : i32
    return %c0_i32, %c0_i32_0 : i32, i32
  }
  func.func @transform_3(%arg0: i32, %arg1: i32) -> (i32, i32) {
    %c0_i32 = arith.constant 0 : i32
    %c0_i32_0 = arith.constant 0 : i32
    %c0_i32_1 = arith.constant 0 : i32
    return %c0_i32, %c0_i32_0 : i32, i32
  }
  func.func @transform_4(%arg0: i32, %arg1: i32) -> (i32, i32) {
    %c0_i32 = arith.constant 0 : i32
    %c0_i32_0 = arith.constant 0 : i32
    %c0_i32_1 = arith.constant 0 : i32
    return %c0_i32, %c0_i32_0 : i32, i32
  }
  func.func @transform_5(%arg0: i32, %arg1: i32) -> (i32, i32) {
    %c0_i32 = arith.constant 0 : i32
    %c0_i32_0 = arith.constant 0 : i32
    return %arg0, %c0_i32 : i32, i32
  }
}

</mosaic_0001>

<bundles_post_ra>
// kernel: tpu_custom_call.1
= control target key start
LH: loop header
LB: loop body
LE: loop exit
PB: predicated region body
PF: predicated region fallthrough
CT: control target
= control target key end

     0   :  { %10 = vsyncpa [#allocation3], 0  ;;  %s397_s0 = inlined_call_operand.hbm [shape: bf16[16,32], index: 0, kind: input, shape index: {}]   ;;  %s398_s1 = inlined_call_operand.hbm [shape: bf16[32,128], index: 1, kind: input, shape index: {}]   ;;  %s399_s2 = inlined_call_operand.vmem [shape: f32[1,128], index: 2, kind: input, shape index: {}]   ;;  %s400_s3 = inlined_call_operand.vmem [shape: f32[1,128], index: 3, kind: input, shape index: {}]   ;;  %s401_s4 = inlined_call_operand.vmem [shape: f32[1,128], index: 4, kind: input, shape index: {}]   ;;  %s402_s5 = inlined_call_operand.hbm [shape: f32[16,128], index: 5, kind: output, shape index: {}]  }
   0x1   :  { %11 = vsyncpa [#allocation6], 0 }
   0x2   :  { %12 = vsyncpa [#allocation4], 0  ;;  %s340_s18 = smov [#allocation2]  }
   0x3   :  { %s18_s19 = sshll.u32 %s340_s18, 4  ;;  %s19_s19 = int_to_ptr.vmem [resolvable:$true] %s18_s19 }
   0x4   :  { %s282_s20 = scalar_lea.vmem %s19_s19, 128  ;;  %p287_p1 = scmp.lt.s32.totalorder %s19_s19, %s19_s19 }
   0x5   :  { %p283_p0 = scmp.ne.s32.totalorder %s19_s19, %s282_s20  ;;  %p288_p2 = scmp.lt.s32.totalorder %s282_s20, %s282_s20 }
   0x7   :  { %p289_p3 = por %p288_p2, %p287_p1 }
   0x9   :  { %p290_p4 = pnand %p289_p3, %p283_p0 }
   0xb   :  { %293 = shalt.err (!%p290_p4)
}
   0xc   :  { %s341_s21 = smov 64   ;;  %s342_s22 = smov 4  }
   0xd   :  { %24 = dma.hbm_to_vmem [thread:$0]  %s397_s0, 128, %s19_s19, [#allocation3], %s341_s21, %s341_s21, %s342_s22  }
   0xe   :  { %s343_s25 = smov [#allocation5]  }
   0xf   :  { %s30_s26 = sshll.u32 %s343_s25, 4  ;;  %s31_s26 = int_to_ptr.vmem [resolvable:$true] %s30_s26 }
  0x10   :  { %s302_s27 = scalar_lea.vmem %s31_s26, 256  ;;  %p307_p6 = scmp.lt.s32.totalorder %s31_s26, %s31_s26 }
  0x11   :  { %p303_p5 = scmp.ne.s32.totalorder %s31_s26, %s302_s27  ;;  %p308_p7 = scmp.lt.s32.totalorder %s302_s27, %s302_s27 }
  0x13   :  { %p309_p8 = por %p308_p7, %p307_p6 }
  0x15   :  { %p310_p9 = pnand %p309_p8, %p303_p5 }
  0x17   :  { %313 = shalt.err (!%p310_p9)
}
  0x18   :  { %36 = dma.hbm_to_vmem [thread:$0]  %s398_s1, 256, %s31_s26, [#allocation6], %s341_s21, %s341_s21, %s342_s22  }
  0x19   :  { %334 = dma.done.wait [#allocation3], 128  }
  0x1a   :  { %335 = vsyncadd [#allocation3], 4294967168 }
  0x1b   :  { %336 = dma.done.wait [#allocation6], 256  }
  0x1c   :  { %337 = vsyncadd [#allocation6], 4294967040  ;;  %v344_v0 = vmov 0.0   ;;  %vm345_vm0 = vmmov 0   ;;  %v259_v1 = vld [vmem:[#allocation5 + $0x8] sm:$0xff]   ;;  %v260_v2 = vld [vmem:[#allocation5] sm:$0xff]  }
  0x1d   :  { %242 = vmatprep.subr.bf16.mxu0 %v344_v0  ;;  %246 = vmatprep.mubr.msk.bf16.mxu0 %vm345_vm0, %v344_v0  ;;  %v261_v3 = vld [vmem:[#allocation2] sm:$0xff]   ;;  %vm81_vm1 = vcmask 261120   ;;  %s346_s8 = smov [#allocation7]  }
  0x1e   :  { %243 = vmatpush3.bf16.msra.mxu0 %v259_v1  ;;  %v236_v5 = vld [vmem:[%s399_s2] ss:$0 sm:$0xff]  ;;  %s219_s9 = sshll.u32 %s346_s8, 4  ;;  %s220_s9 = int_to_ptr.vmem [resolvable:$true] %s219_s9 }
  0x1f   :  { %244 = vmatprep.subr.bf16.mxu0 %v344_v0  ;;  %v237_v44 = vld [vmem:[%s400_s3] ss:$0 sm:$0xff]  ;;  %s314_s3 = scalar_lea.vmem %s220_s9, 256  ;;  %p319_p11 = scmp.lt.s32.totalorder %s220_s9, %s220_s9 }
  0x20   :  { %v238_v46 = vld [vmem:[%s401_s4] ss:$0 sm:$0xff]  ;;  %p315_p10 = scmp.ne.s32.totalorder %s220_s9, %s314_s3  ;;  %p320_p12 = scmp.lt.s32.totalorder %s314_s3, %s314_s3 }
  0x22   :  { %245 = vmatpush3.bf16.msra.mxu0 %v260_v2  ;;  %p321_p13 = por %p320_p12, %p319_p11 }
  0x24   :  { %p322_p0 = pnand %p321_p13, %p315_p10 }
  0x25   :  { %247 = vmatmul.mubr.msk.bf16.vlgmr.msra.gmra.mxu0 %vm81_vm1, %v261_v3 }
  0xe5   :  { %v119_v4 = vpop.f32.mrf.mxu0 }
  0xe6   :  { %v142_v7 = vadd.f32 %v236_v5, %v119_v4 }
  0xe7   :  { %v248_v6 = vpop.f32.mrf.mxu0 }
  0xe8   :  { %144 = vmax.xlane.f32.xlu0 %v142_v7 }
  0xe9   :  { %v122_v8 = vpop.f32.mrf.mxu0 }
  0xea   :  { %v143_v10 = vadd.f32 %v236_v5, %v122_v8 }
  0xeb   :  { %v249_v9 = vpop.f32.mrf.mxu0 }
  0xec   :  { %146 = vmax.xlane.f32.xlu0 %v143_v10 }
 0x171   :  { %v145_v11 = vpop.xlane.xlu0 %144 }
 0x172   :  { %v148_v12 = vsub.f32 %v142_v7, %v145_v11 }
 0x174   :  { %v150_v13 = vmul.f32 1.442695, %v148_v12 }
 0x175   :  { %v147_v14 = vpop.xlane.xlu0 %146 }
 0x176   :  { %262 = vpow2.f32 %v150_v13  ;;  %v149_v15 = vsub.f32 %v143_v10, %v147_v14 }
 0x178   :  { %v152_v16 = vmul.f32 1.442695, %v149_v15 }
 0x17a   :  { %264 = vpow2.f32 %v152_v16 }
 0x183   :  { %v263_v17 = vpop.eup %262 }
 0x184   :  { %154 = vadd.xlane.f32.xlu1 %v263_v17 }
 0x187   :  { %v265_v18 = vpop.eup %264 }
 0x188   :  { %156 = vadd.xlane.f32.xlu1 %v265_v18 }
 0x20d   :  { %v155_v19 = vpop.xlane.xlu1 %154 }
 0x20e   :  { %266 = vrcp.f32 %v155_v19 }
 0x211   :  { %v157_v20 = vpop.xlane.xlu1 %156 }
 0x212   :  { %268 = vrcp.f32 %v157_v20 }
 0x21b   :  { %v267_v21 = vpop.eup %266 }
 0x21c   :  { %v160_v22 = vmul.f32 %v267_v21, %v263_v17 }
 0x21e   :  { %v162_v23 = vmul.f32 %v160_v22, %v142_v7 }
 0x21f   :  { %v269_v24 = vpop.eup %268 }
 0x220   :  { %v164_v25 = vadd.f32 %v162_v23, %v142_v7  ;;  %v161_v26 = vmul.f32 %v269_v24, %v265_v18 }
 0x222   :  { %166 = vadd.xlane.f32.xlu0 %v164_v25  ;;  %v163_v27 = vmul.f32 %v161_v26, %v143_v10 }
 0x224   :  { %v165_v28 = vadd.f32 %v163_v27, %v143_v10 }
 0x226   :  { %168 = vadd.xlane.f32.xlu1 %v165_v28 }
 0x2ab   :  { %v167_v29 = vpop.xlane.xlu0 %166 }
 0x2ac   :  { %v170_v30 = vmul.f32 0.0078125, %v167_v29 }
 0x2ae   :  { %v172_v31 = vsub.f32 %v164_v25, %v170_v30 }
 0x2af   :  { %v169_v32 = vpop.xlane.xlu1 %168 }
 0x2b0   :  { %v171_v33 = vmul.f32 0.0078125, %v169_v32  ;;  %v174_v34 = vmul.f32 %v172_v31, %v172_v31 }
 0x2b2   :  { %v173_v35 = vsub.f32 %v165_v28, %v171_v33  ;;  %176 = vadd.xlane.f32.xlu0 %v174_v34 }
 0x2b4   :  { %v175_v36 = vmul.f32 %v173_v35, %v173_v35 }
 0x2b6   :  { %178 = vadd.xlane.f32.xlu1 %v175_v36 }
 0x33b   :  { %v177_v37 = vpop.xlane.xlu0 %176 }
 0x33c   :  { %v180_v38 = vmul.f32 0.0078125, %v177_v37 }
 0x33e   :  { %v182_v39 = vadd.f32 1e-05, %v180_v38 }
 0x33f   :  { %v179_v40 = vpop.xlane.xlu1 %178 }
 0x340   :  { %270 = vrsqrt.f32 %v182_v39  ;;  %v181_v41 = vmul.f32 0.0078125, %v179_v40 }
 0x342   :  { %v183_v42 = vadd.f32 1e-05, %v181_v41 }
 0x344   :  { %272 = vrsqrt.f32 %v183_v42 }
 0x34d   :  { %v271_v43 = vpop.eup %270 }
 0x34e   :  { %v186_v45 = vmul.f32 %v271_v43, %v172_v31 }
 0x350   :  { %v195_v47 = vmul.f32 %v237_v44, %v186_v45 }
 0x351   :  { %v273_v48 = vpop.eup %272 }
 0x352   :  { %v187_v49 = vmul.f32 %v273_v48, %v173_v35  ;;  %v204_v50 = vadd.f32 %v238_v46, %v195_v47 }
 0x354   :  { %v196_v51 = vmul.f32 %v237_v44, %v187_v49  ;;  %vm206_vm2 = vcmp.ge.f32.partialorder %v204_v50, 0.0  ;;  %v208_v52 = vmul.f32 0.2, %v204_v50 }
 0x356   :  { %v205_v53 = vadd.f32 %v238_v46, %v196_v51  ;;  %v210_v54 = vsel %vm206_vm2, %v204_v50, %v208_v52 }
 0x357   :  { %212 = vst [vmem:[#allocation7] sm:$0xff] %v210_v54 }
 0x358   :  { %vm207_vm3 = vcmp.ge.f32.partialorder %v205_v53, 0.0  ;;  %v209_v55 = vmul.f32 0.2, %v205_v53 }
 0x35a   :  { %v211_v56 = vsel %vm207_vm3, %v205_v53, %v209_v55 }
 0x35b   :  { %213 = vst [vmem:[#allocation7 + $0x8] sm:$0xff] %v211_v56 }
 0x35c   :  { %325 = shalt.err (!%p322_p0)
}
 0x35d   :  { %s347_s4 = smov 128   ;;  %s348_s10 = smov 8  }
 0x35e   :  { %225 = dma.vmem_to_hbm [thread:$0]  %s220_s9, 256, %s402_s5, [#allocation4], %s347_s4, %s347_s4, %s348_s10  }
 0x35f   :  { %338 = dma.done.wait [#allocation4], 256  }
 0x360   :  { %339 = vsyncadd [#allocation4], 4294967040 }
 0x361   :  { %229 = vsyncpa [#allocation3], 1 }
 0x362   :  { %230 = vsyncpa [#allocation6], 1 }
 0x363   :  { %231 = vsyncpa [#allocation4], 1 }

</bundles_post_ra>
